<compile_context>
chip_gen: v7x
topology: tpu7x:2x2x1
jax: 0.10.0
libtpu: 0.0.40
codegen_flags: <defaults>
</compile_context>

<pallas_src>
import functools

import jax
import jax.numpy as jnp
import numpy as np
from jax.experimental import pallas as pl
from jax.experimental.pallas import tpu as pltpu

_LOG_CLAMP = -100.0  # PyTorch BCELoss clamps each log term at -100


def _weighted_sigmoid_loss_kernel(x_ref, w_ref, out_ref, *, n_valid):
    # x_ref: (3, N) f32 in VMEM, rows = [d0, d1, judge]
    # w_ref: (1,)   f32 in SMEM (learnable scalar w_tild)
    # out_ref: (1,) f32 in SMEM (scalar loss)
    d0 = x_ref[0:1, :]
    d1 = x_ref[1:2, :]
    judge = x_ref[2:3, :]

    per = (judge + 1.0) * 0.5

    s = d0 + d1
    pos = s > 0.0
    # Safe divide: denominator forced to 1 where s <= 0, result masked to 0.
    norm_dist = jnp.where(pos, (d0 - d1) / jnp.where(pos, s, 1.0), 0.0)

    # Broadcast the SMEM scalar before exp so the transcendental runs on the
    # EUP vector path (one vreg, free) rather than a scalar-unit exp.
    ew = jnp.exp(jnp.broadcast_to(w_ref[0], norm_dist.shape))
    p = jax.nn.sigmoid(ew * norm_dist)

    # BCELoss with PyTorch's log clamp (handles p == 0 / p == 1 exactly).
    log_p = jnp.maximum(jnp.log(p), _LOG_CLAMP)
    log_1mp = jnp.maximum(jnp.log(1.0 - p), _LOG_CLAMP)
    bce = -(per * log_p + (1.0 - per) * log_1mp)

    out_ref[0] = jnp.sum(bce) * np.float32(1.0 / n_valid)


def weighted_sigmoid_loss(d0, d1, judge, w_tild):
    """d0, d1, judge: any shape with N elements (module uses N=50);
    w_tild: learnable scalar parameter (shape () or (1,)).
    Returns the scalar BCE loss as float32."""
    n = int(np.prod(d0.shape))
    assert int(np.prod(d1.shape)) == n and int(np.prod(judge.shape)) == n

    # Single stacked input: rows = [d0, d1, judge], no padding (full-extent
    # blocks are exempt from the (8,128) divisibility rule).
    x = jnp.stack(
        [
            d0.reshape(-1).astype(jnp.float32),
            d1.reshape(-1).astype(jnp.float32),
            judge.reshape(-1).astype(jnp.float32),
        ],
        axis=0,
    )  # (3, n)
    w = jnp.asarray(w_tild, dtype=jnp.float32).reshape(1)

    out = pl.pallas_call(
        functools.partial(_weighted_sigmoid_loss_kernel, n_valid=n),
        out_shape=jax.ShapeDtypeStruct((1,), jnp.float32),
        in_specs=[
            pl.BlockSpec(memory_space=pltpu.MemorySpace.VMEM),  # (3, n) stacked inputs
            pl.BlockSpec(memory_space=pltpu.MemorySpace.SMEM),  # w_tild scalar
        ],
        out_specs=pl.BlockSpec(memory_space=pltpu.MemorySpace.SMEM),  # scalar loss
    )(x, w)
    return out[0]


def _reference(d0, d1, judge, w_tild):
    """Pure-JAX reference mirroring the PyTorch module."""
    d0f = d0.reshape(-1).astype(jnp.float32)
    d1f = d1.reshape(-1).astype(jnp.float32)
    per = (judge.reshape(-1).astype(jnp.float32) + 1.0) / 2.0
    s = d0f + d1f
    norm_dist = jnp.where(s > 0.0, (d0f - d1f) / jnp.where(s > 0.0, s, 1.0), 0.0)
    p = jax.nn.sigmoid(jnp.exp(jnp.asarray(w_tild, jnp.float32).reshape(())) * norm_dist)
    log_p = jnp.maximum(jnp.log(p), _LOG_CLAMP)
    log_1mp = jnp.maximum(jnp.log(1.0 - p), _LOG_CLAMP)
    return jnp.mean(-(per * log_p + (1.0 - per) * log_1mp))


if __name__ == "__main__":
    # The forward hard-codes a view(50): batch of 50 distance pairs + judgements.
    N = 50
    key = jax.random.PRNGKey(0)
    k0, k1, k2 = jax.random.split(key, 3)

    # Distances are non-negative; judge in [-1, 1] so per = (judge+1)/2 in [0, 1].
    d0 = jax.random.uniform(k0, (N,), dtype=jnp.float32)
    d1 = jax.random.uniform(k1, (N,), dtype=jnp.float32)
    judge = jax.random.uniform(k2, (N,), dtype=jnp.float32, minval=-1.0, maxval=1.0)

    # Module initializes w_tild = 1.0 (nn.Parameter(torch.tensor([1.0]))).
    w_tild = jnp.array([1.0], dtype=jnp.float32)

    out = weighted_sigmoid_loss(d0, d1, judge, w_tild)
    out = jax.block_until_ready(out)

    ref = _reference(d0, d1, judge, w_tild)
    np.testing.assert_allclose(np.asarray(out), np.asarray(ref), rtol=1e-5, atol=1e-5)

    assert out.shape == ()
    print("KERNEL_OK")
</pallas_src>

<mosaic_0001>
module attributes {stable_mosaic.version = 11 : i64} {
  func.func @_weighted_sigmoid_loss_kernel(%arg0: memref<3x50xf32, #tpu.memory_space<vmem>>, %arg1: memref<1xf32, #tpu.memory_space<smem>>, %arg2: memref<1xf32, #tpu.memory_space<smem>>) attributes {dimension_semantics = [], scalar_prefetch = 0 : i64, scratch_operands = 0 : i64, tpu.core_type = #tpu.core_type<tc>} {
    %c0 = arith.constant 0 : index
    %c0_0 = arith.constant 0 : index
    %0 = vector.load %arg0[%c0, %c0_0] : memref<3x50xf32, #tpu.memory_space<vmem>>, vector<1x50xf32>
    %c1 = arith.constant 1 : index
    %c0_1 = arith.constant 0 : index
    %1 = vector.load %arg0[%c1, %c0_1] : memref<3x50xf32, #tpu.memory_space<vmem>>, vector<1x50xf32>
    %c2 = arith.constant 2 : index
    %c0_2 = arith.constant 0 : index
    %2 = vector.load %arg0[%c2, %c0_2] : memref<3x50xf32, #tpu.memory_space<vmem>>, vector<1x50xf32>
    %cst = arith.constant 1.000000e+00 : f32
    %3 = vector.broadcast %cst : f32 to vector<1x50xf32>
    %4 = arith.addf %2, %3 : vector<1x50xf32>
    %cst_3 = arith.constant 5.000000e-01 : f32
    %5 = vector.broadcast %cst_3 : f32 to vector<1x50xf32>
    %6 = arith.mulf %4, %5 : vector<1x50xf32>
    %7 = arith.addf %0, %1 : vector<1x50xf32>
    %cst_4 = arith.constant 0.000000e+00 : f32
    %8 = vector.broadcast %cst_4 : f32 to vector<1x50xf32>
    %9 = arith.cmpf ogt, %7, %8 : vector<1x50xf32>
    %10 = arith.subf %0, %1 : vector<1x50xf32>
    %cst_5 = arith.constant 1.000000e+00 : f32
    %11 = vector.broadcast %cst_5 : f32 to vector<1x50xf32>
    %12 = arith.select %9, %7, %11 : vector<1x50xi1>, vector<1x50xf32>
    %13 = arith.divf %10, %12 : vector<1x50xf32>
    %cst_6 = arith.constant 0.000000e+00 : f32
    %14 = vector.broadcast %cst_6 : f32 to vector<1x50xf32>
    %15 = arith.select %9, %13, %14 : vector<1x50xi1>, vector<1x50xf32>
    %c0_7 = arith.constant 0 : index
    %16 = memref.load %arg1[%c0_7] : memref<1xf32, #tpu.memory_space<smem>>
    %17 = vector.broadcast %16 : f32 to vector<1x50xf32>
    %18 = math.exp %17 : vector<1x50xf32>
    %19 = arith.mulf %18, %15 : vector<1x50xf32>
    %20 = arith.negf %19 : vector<1x50xf32>
    %21 = math.exp %20 : vector<1x50xf32>
    %cst_8 = arith.constant 1.000000e+00 : f32
    %22 = vector.broadcast %cst_8 : f32 to vector<1x50xf32>
    %23 = arith.addf %22, %21 : vector<1x50xf32>
    %24 = arith.divf %22, %23 : vector<1x50xf32>
    %25 = math.log %24 : vector<1x50xf32>
    %cst_9 = arith.constant -1.000000e+02 : f32
    %26 = vector.broadcast %cst_9 : f32 to vector<1x50xf32>
    %27 = arith.maximumf %25, %26 : vector<1x50xf32>
    %cst_10 = arith.constant 1.000000e+00 : f32
    %28 = vector.broadcast %cst_10 : f32 to vector<1x50xf32>
    %29 = arith.subf %28, %24 : vector<1x50xf32>
    %30 = math.log %29 : vector<1x50xf32>
    %cst_11 = arith.constant -1.000000e+02 : f32
    %31 = vector.broadcast %cst_11 : f32 to vector<1x50xf32>
    %32 = arith.maximumf %30, %31 : vector<1x50xf32>
    %33 = arith.mulf %6, %27 : vector<1x50xf32>
    %cst_12 = arith.constant 1.000000e+00 : f32
    %34 = vector.broadcast %cst_12 : f32 to vector<1x50xf32>
    %35 = arith.subf %34, %6 : vector<1x50xf32>
    %36 = arith.mulf %35, %32 : vector<1x50xf32>
    %37 = arith.addf %33, %36 : vector<1x50xf32>
    %cst_13 = arith.constant 0.000000e+00 : f32
    %38 = vector.broadcast %cst_13 : f32 to vector<1x50xf32>
    %39 = arith.subf %38, %37 : vector<1x50xf32>
    %40 = vector.shape_cast %39 : vector<1x50xf32> to vector<1x1x50xf32>
    %cst_14 = arith.constant dense<0.000000e+00> : vector<1xf32>
    %41 = vector.multi_reduction <add>, %40, %cst_14 [1, 2] : vector<1x1x50xf32> to vector<1xf32>
    %42 = vector.shape_cast %41 : vector<1xf32> to vector<1x1x1xf32>
    %43 = vector.extract %42[0, 0, 0] : f32 from vector<1x1x1xf32>
    %cst_15 = arith.constant 2.000000e-02 : f32
    %44 = arith.mulf %43, %cst_15 : f32
    %c0_16 = arith.constant 0 : index
    %45 = memref.load %arg2[%c0_16] : memref<1xf32, #tpu.memory_space<smem>>
    memref.store %44, %arg2[%c0_16] : memref<1xf32, #tpu.memory_space<smem>>
    return
  }
}

</mosaic_0001>

<bundles_post_ra>
// kernel: tpu_custom_call.1
= control target key start
LH: loop header
LB: loop body
LE: loop exit
PB: predicated region body
PF: predicated region fallthrough
CT: control target
= control target key end

     0   :  { %8 = vsyncpa [#allocation4], 0  ;;  %s185_s0 = inlined_call_operand.hbm [shape: f32[3,50], index: 0, kind: input, shape index: {}]   ;;  %s186_s1 = inlined_call_operand.<no memory space> [shape: f32[1], index: 1, kind: input, shape index: {}]   ;;  %s187_s2 = inlined_call_operand.hbm [shape: f32[1], index: 2, kind: output, shape index: {}]  }
   0x1   :  { %9 = vsyncpa [#allocation5], 0  ;;  %s141_s9 = smov [#allocation3]   ;;  %s105_s13 = scalar_lea.hbm %s185_s0, 64 }
   0x2   :  { %s16_s10 = sshll.u32 %s141_s9, 4  ;;  %p106_p0 = scmp.ne.s32.totalorder %s185_s0, %s105_s13  ;;  %s17_s10 = int_to_ptr.vmem [resolvable:$true] %s16_s10 }
   0x3   :  { %p109_p1 = scmp.lt.u32.totalorder %s105_s13, %s185_s0 }
   0x5   :  { %p111_p2 = pnand %p109_p1, %p106_p0 }
   0x7   :  { %114 = shalt.err (!%p111_p2)
}
   0x8   :  { %s115_s18 = scalar_lea.vmem %s17_s10, 64  ;;  %p120_p4 = scmp.lt.s32.totalorder %s17_s10, %s17_s10 }
   0x9   :  { %p116_p3 = scmp.ne.s32.totalorder %s17_s10, %s115_s18  ;;  %p121_p5 = scmp.lt.s32.totalorder %s115_s18, %s115_s18 }
   0xb   :  { %p122_p6 = por %p121_p5, %p120_p4 }
   0xd   :  { %p123_p7 = pnand %p122_p6, %p116_p3 }
   0xf   :  { %126 = shalt.err (!%p123_p7)
}
  0x10   :  { %19 = dma.hbm_to_vmem [thread:$0]  %s185_s0, 64, %s17_s10, [#allocation4]  }
  0x11   :  { %137 = dma.done.wait [#allocation4], 64  }
  0x12   :  { %138 = vsyncadd [#allocation4], 4294967232  ;;  %v38_v0 = vstv %s186_s1  ;;  %v25_v1 = vld [vmem:[#allocation3] sm:$0x1]  ;;  %v26_v2 = vld [vmem:[#allocation3 + $0x1] sm:$0x1] }
  0x13   :  { %v30_v3 = vadd.f32 %v26_v2, %v25_v1  ;;  %v39_v4 = vmul.f32 1.442695, %v38_v0  ;;  %v32_v6 = vsub.f32 %v25_v1, %v26_v2  ;;  %v27_v17 = vld [vmem:[#allocation3 + $0x2] sm:$0x1]  ;;  %vm60_vm1 = vcmask 401408   ;;  %s127_s25 = scalar_lea.hbm %s187_s2, 16 }
  0x14   :  { %v28_v18 = vadd.f32 1.0, %v27_v17  ;;  %p128_p8 = scmp.ne.s32.totalorder %s187_s2, %s127_s25  ;;  %p131_p9 = scmp.lt.u32.totalorder %s127_s25, %s187_s2 }
  0x15   :  { %vm31_vm0 = vcmp.gt.f32.partialorder %v30_v3, 0.0 }
  0x16   :  { %v33_v5 = vsel %vm31_vm0, %v30_v3, 1.0  ;;  %v29_v19 = vmul.f32 0.5, %v28_v18  ;;  %p133_p10 = pnand %p131_p9, %p128_p8 }
  0x17   :  { %93 = vrcp.f32 %v33_v5 }
  0x18   :  { %95 = vpow2.f32 %v39_v4  ;;  %v56_v25 = vsub.f32 1.0, %v29_v19 }
  0x21   :  { %v94_v7 = vpop.eup %93 }
  0x22   :  { %v96_v8 = vpop.eup %95  ;;  %v35_v9 = vmul.f32 %v94_v7, %v32_v6 }
  0x24   :  { %v36_v10 = vsel %vm31_vm0, %v35_v9, 0.0 }
  0x25   :  { %v41_v11 = vmul.f32 %v96_v8, %v36_v10 }
  0x27   :  { %v88_v12 = vmul.f32 -1.442695, %v41_v11 }
  0x29   :  { %97 = vpow2.f32 %v88_v12 }
  0x33   :  { %v98_v13 = vpop.eup %97 }
  0x34   :  { %v45_v14 = vadd.f32 1.0, %v98_v13 }
  0x36   :  { %99 = vrcp.f32 %v45_v14 }
  0x40   :  { %v100_v15 = vpop.eup %99 }
  0x41   :  { %101 = vlog2.f32 %v100_v15  ;;  %v51_v16 = vsub.f32 1.0, %v100_v15 }
  0x43   :  { %103 = vlog2.f32 %v51_v16 }
  0x4b   :  { %v102_v20 = vpop.eup %101 }
  0x4c   :  { %v49_v21 = vmul.f32 0.6931472, %v102_v20 }
  0x4d   :  { %v104_v22 = vpop.eup %103 }
  0x4e   :  { %v50_v23 = vmax.f32 %v49_v21, -100.0  ;;  %v53_v24 = vmul.f32 0.6931472, %v104_v22 }
  0x50   :  { %v54_v26 = vmax.f32 %v53_v24, -100.0  ;;  %v55_v27 = vmul.f32 %v50_v23, %v29_v19 }
  0x52   :  { %v57_v28 = vmul.f32 %v56_v25, %v54_v26 }
  0x54   :  { %v58_v29 = vadd.f32 %v57_v28, %v55_v27 }
  0x56   :  { %v59_v30 = vsub.f32 0.0, %v58_v29 }
  0x58   :  { %v61_v31 = vsel %vm60_vm1, %v59_v30, 0.0 }
  0x59   :  { %62 = vadd.xlane.f32.xlu0 %v61_v31 }
  0xe6   :  { %v63_v32 = vpop.xlane.xlu0 %62 }
  0xe7   :  { %v64_v33 = vrot.slane %v63_v32, 4 }
  0xe9   :  { %v65_v34 = vadd.f32 %v64_v33, %v63_v32 }
  0xeb   :  { %v66_v35 = vrot.slane %v65_v34, 2 }
  0xed   :  { %v67_v36 = vadd.f32 %v66_v35, %v65_v34 }
  0xef   :  { %v68_v37 = vrot.slane %v67_v36, 1 }
  0xf1   :  { %v69_v38 = vadd.f32 %v68_v37, %v67_v36 }
  0xf3   :  { %89 = vpush %v69_v38 }
 0x124   :  { %s90_s0 = spop %89 }
 0x125   :  { %s71_s1 = smul.f32 0.02, %s90_s0 }
 0x127   :  { %73 = sst [smem:[#allocation6]] %s71_s1 }
 0x128   :  { %136 = shalt.err (!%p133_p10)
}
 0x129   :  { %s142_s30 = smov [#allocation6]  }
 0x12a   :  { %81 = dma.smem_to_hbm %s142_s30, 16, %s187_s2, [#allocation5]  }
 0x12b   :  { %139 = dma.done.wait [#allocation5], 16  }
 0x12c   :  { %140 = vsyncadd [#allocation5], 4294967280 }
 0x12d   :  { %85 = sfence }
 0x12e   :  { %86 = vsyncpa [#allocation4], 1 }
 0x12f   :  { %87 = vsyncpa [#allocation5], 1 }

</bundles_post_ra>
